<compile_context>
chip_gen: v7x
topology: tpu7x:2x2x1
jax: 0.10.0
libtpu: 0.0.40
codegen_flags: <defaults>
</compile_context>

<pallas_src>
import functools

import jax
import jax.numpy as jnp
from jax import lax
from jax.experimental import pallas as pl
from jax.experimental.pallas import tpu as pltpu


def _round_up(v, m):
    return (v + m - 1) // m * m


# --------------------------------------------------------------------------
# Kernel: one grid step == one StackGatedCNN layer.
# --------------------------------------------------------------------------
def _stack_gated_cnn_kernel(x_ref, wcg_ref, g1_ref, bt1_ref, w1_ref, b1_ref,
                            w2_ref, b2_ref, g2_ref, bt2_ref, o_ref,
                            *, seq_len, true_h, kernel_size):
    layer = pl.program_id(0)

    # The output block (constant index_map) is resident across the whole grid
    # and doubles as the running activation.  Initialize it from the input on
    # the first layer.
    @pl.when(layer == 0)
    def _():
        o_ref[...] = x_ref[...]

    x = o_ref[...]                          # (Mp, Hp) f32
    Mp, Hp = x.shape
    k = kernel_size
    pad = (k - 1) // 2
    inv_h = 1.0 / float(true_h)

    # Per-batch sequence position of each flattened row, and lane validity of
    # the (possibly) padded hidden dim.  Hoisted: used by every tap / LN.
    seq_pos = lax.broadcasted_iota(jnp.int32, (Mp, 1), 0) % seq_len
    lane_ok = lax.broadcasted_iota(jnp.int32, (1, Hp), 1) < true_h

    def layer_norm(v, gamma, beta):
        # Padded lanes of v are exactly zero, so sum/true_h == true mean.
        mean = jnp.sum(v, axis=-1, keepdims=True) * inv_h
        d = jnp.where(lane_ok, v - mean, 0.0)
        var = jnp.sum(d * d, axis=-1, keepdims=True) * inv_h
        # gamma/beta are zero-padded -> padded lanes stay exactly zero.
        return d * lax.rsqrt(var + 1e-5) * gamma + beta

    # Gated conv: for each tap, multiply a rolled + boundary-masked copy of x
    # by the fused (conv ‖ gate) weight (Hp, 2*Hp) in a single MXU matmul.
    acc = jnp.zeros((Mp, 2 * Hp), jnp.float32)
    for t in range(k):
        shift = pad - t                     # static Python int
        xt = x
        if shift != 0:
            xt = pltpu.roll(xt, shift % Mp, 0)     # XLU sublane rotate
            if shift > 0:
                valid = seq_pos >= shift           # rows that read x[<0]
            else:
                valid = seq_pos < seq_len + shift  # rows that read x[>=S]
            xt = jnp.where(valid, xt, 0.0)
        acc = acc + jnp.dot(xt.astype(jnp.bfloat16), wcg_ref[0, t],
                            preferred_element_type=jnp.float32)

    a = acc[:, :Hp]
    b = acc[:, Hp:]
    x = layer_norm(x + a * jax.nn.sigmoid(b), g1_ref[0], bt1_ref[0])

    # Feed-forward: relu(x @ W1 + b1) @ W2 + b2, residual, LayerNorm.
    l1 = jnp.dot(x.astype(jnp.bfloat16), w1_ref[0],
                 preferred_element_type=jnp.float32) + b1_ref[0]
    l1 = jnp.maximum(l1, 0.0)
    l2 = jnp.dot(l1.astype(jnp.bfloat16), w2_ref[0],
                 preferred_element_type=jnp.float32) + b2_ref[0]
    x = layer_norm(x + l2, g2_ref[0], bt2_ref[0])

    o_ref[...] = x


# --------------------------------------------------------------------------
# Wrapper: pack/pad parameters, launch the kernel, un-pad the result.
# --------------------------------------------------------------------------
def _pack_params(params, hp):
    """Fuse conv+gate weights, pad to lane-dense Hp, cast matmul weights bf16."""
    wc, wg, g1, bt1, w1, b1, w2, b2, g2, bt2 = params
    _, _, h, _ = wc.shape
    ph = hp - h

    def pad_mat(w):                      # pad last two (in, out) dims to Hp
        cfg = [(0, 0)] * (w.ndim - 2) + [(0, ph), (0, ph)]
        return jnp.pad(w, cfg)

    def pad_vec(v):                      # (L, H) -> (L, 1, Hp)
        return jnp.pad(v, ((0, 0), (0, ph)))[:, None, :].astype(jnp.float32)

    wcg = jnp.concatenate([pad_mat(wc), pad_mat(wg)], axis=-1)   # (L,k,Hp,2Hp)
    return (wcg.astype(jnp.bfloat16),
            pad_vec(g1), pad_vec(bt1),
            pad_mat(w1).astype(jnp.bfloat16), pad_vec(b1),
            pad_mat(w2).astype(jnp.bfloat16), pad_vec(b2),
            pad_vec(g2), pad_vec(bt2))


def stack_gated_cnn(x, params):
    wc = params[0]
    L, k, H, _ = wc.shape
    B, S, _ = x.shape
    # PyTorch Conv1d with padding=(k-1)//2 only keeps the length for odd k.
    assert k % 2 == 1, "even kernel_size diverges from the PyTorch module"

    Hp = _round_up(H, 128)               # lane-dense hidden dim
    M = B * S
    Mp = _round_up(M, 8)                 # sublane-dense row count

    packed = _pack_params(params, Hp)

    x_p = jnp.pad(x.astype(jnp.float32), ((0, 0), (0, 0), (0, Hp - H)))
    x_p = x_p.reshape(M, Hp)
    if Mp != M:
        x_p = jnp.pad(x_p, ((0, Mp - M), (0, 0)))

    kernel = functools.partial(_stack_gated_cnn_kernel,
                               seq_len=S, true_h=H, kernel_size=k)

    act_spec = pl.BlockSpec((Mp, Hp), lambda l: (0, 0))
    cnv_spec = pl.BlockSpec((1, k, Hp, 2 * Hp), lambda l: (l, 0, 0, 0))
    mat_spec = pl.BlockSpec((1, Hp, Hp), lambda l: (l, 0, 0))
    vec_spec = pl.BlockSpec((1, 1, Hp), lambda l: (l, 0, 0))

    grid_spec = pltpu.PrefetchScalarGridSpec(
        num_scalar_prefetch=0,
        grid=(L,),
        in_specs=[
            act_spec,   # x (fetched once; constant index_map)
            cnv_spec,   # fused conv+gate weights  (bf16)
            vec_spec,   # LN1 gamma
            vec_spec,   # LN1 beta
            mat_spec,   # W1 (in, out)             (bf16)
            vec_spec,   # b1
            mat_spec,   # W2 (in, out)             (bf16)
            vec_spec,   # b2
            vec_spec,   # LN2 gamma
            vec_spec,   # LN2 beta
        ],
        out_specs=act_spec,              # resident running activation
    )

    # Explicit VMEM budget: double-buffered per-layer weights + activation
    # blocks, with margin; clamp to stay inside v7x's 64 MiB physical VMEM.
    per_layer_w = (k * Hp * 2 * Hp + 2 * Hp * Hp) * 2 + 6 * Hp * 4
    act_bytes = Mp * Hp * 4
    vmem_limit = min(max(2 * per_layer_w + 4 * act_bytes + (4 << 20), 32 << 20),
                     60 << 20)

    out = pl.pallas_call(
        kernel,
        out_shape=jax.ShapeDtypeStruct((Mp, Hp), jnp.float32),
        grid_spec=grid_spec,
        compiler_params=pltpu.CompilerParams(
            dimension_semantics=("arbitrary",),   # layers are sequential
            vmem_limit_bytes=int(vmem_limit)),
    )(x_p, *packed)

    return out[:M, :H].reshape(B, S, H).astype(x.dtype)


# --------------------------------------------------------------------------
# Pure-JAX f32 reference (identical semantics to the PyTorch module).
# --------------------------------------------------------------------------
def ref_forward(x, params):
    wc, wg, g1, bt1, w1, b1, w2, b2, g2, bt2 = params
    L, k, H, _ = wc.shape
    B, S, _ = x.shape
    pad = (k - 1) // 2

    def conv(xx, w):
        xp = jnp.pad(xx, ((0, 0), (pad, pad), (0, 0)))
        out = jnp.zeros((B, S, H), jnp.float32)
        for t in range(k):
            out = out + jnp.einsum('bsh,ho->bso', xp[:, t:t + S, :], w[t])
        return out

    def ln(v, gamma, beta):
        mean = jnp.mean(v, -1, keepdims=True)
        var = jnp.mean((v - mean) ** 2, -1, keepdims=True)
        return (v - mean) * lax.rsqrt(var + 1e-5) * gamma + beta

    for l in range(L):
        a = conv(x, wc[l])
        b = conv(x, wg[l])
        x = ln(x + a * jax.nn.sigmoid(b), g1[l], bt1[l])
        l1 = jnp.maximum(jnp.einsum('bsh,ho->bso', x, w1[l]) + b1[l], 0.0)
        l2 = jnp.einsum('bsh,ho->bso', l1, w2[l]) + b2[l]
        x = ln(x + l2, g2[l], bt2[l])
    return x


def init_params(key, num_layers, hidden_size, kernel_size):
    L, H, k = num_layers, hidden_size, kernel_size
    ks = jax.random.split(key, 6)
    scale = 0.1
    # Conv1d weight is [out, in, k] in torch; stored here as [L, k, in, out]
    # so each tap is directly an (in, out) matmul operand.
    wc = scale * jax.random.normal(ks[0], (L, k, H, H), jnp.float32)
    wg = scale * jax.random.normal(ks[1], (L, k, H, H), jnp.float32)
    # Linear weights stored pre-transposed as (in, out); biases as [L, H].
    w1 = scale * jax.random.normal(ks[2], (L, H, H), jnp.float32)
    b1 = scale * jax.random.normal(ks[3], (L, H), jnp.float32)
    w2 = scale * jax.random.normal(ks[4], (L, H, H), jnp.float32)
    b2 = scale * jax.random.normal(ks[5], (L, H), jnp.float32)
    # LayerNorm default init: gamma = 1, beta = 0.
    g1 = jnp.ones((L, H), jnp.float32)
    bt1 = jnp.zeros((L, H), jnp.float32)
    g2 = jnp.ones((L, H), jnp.float32)
    bt2 = jnp.zeros((L, H), jnp.float32)
    return (wc, wg, g1, bt1, w1, b1, w2, b2, g2, bt2)


if __name__ == "__main__":
    B, S, H = 2, 8, 32           # batch, seq, hidden_size
    num_layers, kernel_size = 2, 3

    key = jax.random.PRNGKey(0)
    kx, kp = jax.random.split(key)
    x = jax.random.normal(kx, (B, S, H), jnp.float32)
    params = init_params(kp, num_layers, H, kernel_size)

    out = jax.block_until_ready(jax.jit(stack_gated_cnn)(x, params))
    ref = jax.block_until_ready(ref_forward(x, params))

    assert out.shape == (B, S, H)
    max_err = float(jnp.max(jnp.abs(out - ref)))
    # Kernel uses bf16 matmul operands (f32 accumulation); allow bf16 drift
    # relative to the pure-f32 reference.
    assert jnp.allclose(out, ref, atol=1e-1, rtol=1e-1), max_err
    print("KERNEL_OK")
</pallas_src>

<mosaic_0001>
module attributes {stable_mosaic.version = 11 : i64} {
  func.func @_stack_gated_cnn_kernel(%arg0: i32, %arg1: memref<16x128xf32, #tpu.memory_space<vmem>>, %arg2: memref<1x3x128x256xbf16, #tpu.memory_space<vmem>>, %arg3: memref<1x1x128xf32, #tpu.memory_space<vmem>>, %arg4: memref<1x1x128xf32, #tpu.memory_space<vmem>>, %arg5: memref<1x128x128xbf16, #tpu.memory_space<vmem>>, %arg6: memref<1x1x128xf32, #tpu.memory_space<vmem>>, %arg7: memref<1x128x128xbf16, #tpu.memory_space<vmem>>, %arg8: memref<1x1x128xf32, #tpu.memory_space<vmem>>, %arg9: memref<1x1x128xf32, #tpu.memory_space<vmem>>, %arg10: memref<1x1x128xf32, #tpu.memory_space<vmem>>, %arg11: memref<16x128xf32, #tpu.memory_space<vmem>>) attributes {dimension_semantics = [#tpu.dimension_semantics<arbitrary>], iteration_bounds = array<i64: 2>, scalar_prefetch = 0 : i64, scratch_operands = 0 : i64, tpu.core_type = #tpu.core_type<tc>, window_params = [{pipeline_mode = #tpu.pipeline_mode<synchronous>, transform_indices = @transform_0, window_bounds = array<i64: 16, 128>}, {transform_indices = @transform_1, window_bounds = array<i64: 1, 3, 128, 256>}, {transform_indices = @transform_2, window_bounds = array<i64: 1, 1, 128>}, {transform_indices = @transform_3, window_bounds = array<i64: 1, 1, 128>}, {transform_indices = @transform_4, window_bounds = array<i64: 1, 128, 128>}, {transform_indices = @transform_5, window_bounds = array<i64: 1, 1, 128>}, {transform_indices = @transform_6, window_bounds = array<i64: 1, 128, 128>}, {transform_indices = @transform_7, window_bounds = array<i64: 1, 1, 128>}, {transform_indices = @transform_8, window_bounds = array<i64: 1, 1, 128>}, {transform_indices = @transform_9, window_bounds = array<i64: 1, 1, 128>}, {pipeline_mode = #tpu.pipeline_mode<synchronous>, transform_indices = @transform_10, window_bounds = array<i64: 16, 128>}]} {
    %c0_i32 = arith.constant 0 : i32
    %0 = arith.cmpi eq, %arg0, %c0_i32 : i32
    %1 = arith.extui %0 : i1 to i32
    %c0_i32_0 = arith.constant 0 : i32
    %2 = arith.cmpi ne, %1, %c0_i32_0 : i32
    scf.if %2 {
      %c0_65 = arith.constant 0 : index
      %c0_66 = arith.constant 0 : index
      %139 = vector.load %arg1[%c0_65, %c0_66] : memref<16x128xf32, #tpu.memory_space<vmem>>, vector<16x128xf32>
      %c0_67 = arith.constant 0 : index
      %c0_68 = arith.constant 0 : index
      %140 = vector.load %arg11[%c0_67, %c0_68] : memref<16x128xf32, #tpu.memory_space<vmem>>, vector<16x128xf32>
      tpu.vector_store %arg11[%c0_67, %c0_68], %139 {strides = array<i32>} : memref<16x128xf32, #tpu.memory_space<vmem>>, vector<16x128xf32>,
    } else {
    }
    %c0 = arith.constant 0 : index
    %c0_1 = arith.constant 0 : index
    %3 = vector.load %arg11[%c0, %c0_1] : memref<16x128xf32, #tpu.memory_space<vmem>>, vector<16x128xf32>
    %4 = tpu.iota {dimensions = array<i32: 0>} : vector<16x1xi32>
    %c8_i32 = arith.constant 8 : i32
    %c0_i32_2 = arith.constant 0 : i32
    %5 = arith.cmpi eq, %c8_i32, %c0_i32_2 : i32
    %c1_i32 = arith.constant 1 : i32
    %6 = arith.select %5, %c1_i32, %c8_i32 : i32
    %7 = vector.broadcast %6 : i32 to vector<16x1xi32>
    %8 = arith.remsi %4, %7 : vector<16x1xi32>
    %c0_i32_3 = arith.constant 0 : i32
    %9 = vector.broadcast %c0_i32_3 : i32 to vector<16x1xi32>
    %10 = arith.cmpi ne, %8, %9 : vector<16x1xi32>
    %c0_i32_4 = arith.constant 0 : i32
    %11 = vector.broadcast %c0_i32_4 : i32 to vector<16x1xi32>
    %12 = arith.cmpi slt, %8, %11 : vector<16x1xi32>
    %c0_i32_5 = arith.constant 0 : i32
    %13 = arith.cmpi slt, %6, %c0_i32_5 : i32
    %14 = vector.broadcast %13 : i1 to vector<16x1xi1>
    %15 = vector.broadcast %14 : vector<16x1xi1> to vector<16x1xi1>
    %16 = arith.xori %12, %15 : vector<16x1xi1>
    %17 = arith.andi %16, %10 : vector<16x1xi1>
    %18 = vector.broadcast %6 : i32 to vector<16x1xi32>
    %19 = arith.addi %8, %18 : vector<16x1xi32>
    %20 = arith.select %17, %19, %8 : vector<16x1xi1>, vector<16x1xi32>
    %21 = tpu.iota {dimensions = array<i32: 1>} : vector<1x128xi32>
    %c32_i32 = arith.constant 32 : i32
    %22 = vector.broadcast %c32_i32 : i32 to vector<1x128xi32>
    %23 = arith.cmpi slt, %21, %22 : vector<1x128xi32>
    %cst = arith.constant 0.000000e+00 : f32
    %24 = vector.broadcast %cst : f32 to vector<16x256xf32>
    %c1_i32_6 = arith.constant 1 : i32
    %25 = tpu.dynamic_rotate %3 by %c1_i32_6 dim 0 : vector<16x128xf32>, i32 -> vector<16x128xf32>
    %c1_i32_7 = arith.constant 1 : i32
    %26 = vector.broadcast %c1_i32_7 : i32 to vector<16x1xi32>
    %27 = arith.cmpi sge, %20, %26 : vector<16x1xi32>
    %cst_8 = arith.constant 0.000000e+00 : f32
    %28 = vector.shape_cast %27 : vector<16x1xi1> to vector<16x1xi1>
    %29 = vector.broadcast %28 : vector<16x1xi1> to vector<16x128xi1>
    %30 = vector.broadcast %cst_8 : f32 to vector<16x128xf32>
    %31 = arith.select %29, %25, %30 : vector<16x128xi1>, vector<16x128xf32>
    %32 = arith.truncf %31 : vector<16x128xf32> to vector<16x128xbf16>
    %c0_9 = arith.constant 0 : index
    %c0_10 = arith.constant 0 : index
    %c0_11 = arith.constant 0 : index
    %c0_12 = arith.constant 0 : index
    %33 = vector.load %arg2[%c0_9, %c0_10, %c0_11, %c0_12] : memref<1x3x128x256xbf16, #tpu.memory_space<vmem>>, vector<1x1x128x256xbf16>
    %34 = vector.shape_cast %33 : vector<1x1x128x256xbf16> to vector<128x256xbf16>
    %cst_13 = arith.constant dense<0.000000e+00> : vector<16x256xf32>
    %35 = tpu.matmul %32, %34, %cst_13 {dimension_numbers = #tpu.dot_dimension_numbers<[1], [0], [0], [1], [0, 0, 1, 1], [], []>} : vector<16x128xbf16>, vector<128x256xbf16>, vector<16x256xf32> -> vector<16x256xf32>
    %36 = arith.addf %24, %35 : vector<16x256xf32>
    %37 = arith.truncf %3 : vector<16x128xf32> to vector<16x128xbf16>
    %c0_14 = arith.constant 0 : index
    %c1 = arith.constant 1 : index
    %c0_15 = arith.constant 0 : index
    %c0_16 = arith.constant 0 : index
    %38 = vector.load %arg2[%c0_14, %c1, %c0_15, %c0_16] : memref<1x3x128x256xbf16, #tpu.memory_space<vmem>>, vector<1x1x128x256xbf16>
    %39 = vector.shape_cast %38 : vector<1x1x128x256xbf16> to vector<128x256xbf16>
    %cst_17 = arith.constant dense<0.000000e+00> : vector<16x256xf32>
    %40 = tpu.matmul %37, %39, %cst_17 {dimension_numbers = #tpu.dot_dimension_numbers<[1], [0], [0], [1], [0, 0, 1, 1], [], []>} : vector<16x128xbf16>, vector<128x256xbf16>, vector<16x256xf32> -> vector<16x256xf32>
    %41 = arith.addf %36, %40 : vector<16x256xf32>
    %c15_i32 = arith.constant 15 : i32
    %42 = tpu.dynamic_rotate %3 by %c15_i32 dim 0 : vector<16x128xf32>, i32 -> vector<16x128xf32>
    %c7_i32 = arith.constant 7 : i32
    %43 = vector.broadcast %c7_i32 : i32 to vector<16x1xi32>
    %44 = arith.cmpi slt, %20, %43 : vector<16x1xi32>
    %cst_18 = arith.constant 0.000000e+00 : f32
    %45 = vector.shape_cast %44 : vector<16x1xi1> to vector<16x1xi1>
    %46 = vector.broadcast %45 : vector<16x1xi1> to vector<16x128xi1>
    %47 = vector.broadcast %cst_18 : f32 to vector<16x128xf32>
    %48 = arith.select %46, %42, %47 : vector<16x128xi1>, vector<16x128xf32>
    %49 = arith.truncf %48 : vector<16x128xf32> to vector<16x128xbf16>
    %c0_19 = arith.constant 0 : index
    %c2 = arith.constant 2 : index
    %c0_20 = arith.constant 0 : index
    %c0_21 = arith.constant 0 : index
    %50 = vector.load %arg2[%c0_19, %c2, %c0_20, %c0_21] : memref<1x3x128x256xbf16, #tpu.memory_space<vmem>>, vector<1x1x128x256xbf16>
    %51 = vector.shape_cast %50 : vector<1x1x128x256xbf16> to vector<128x256xbf16>
    %cst_22 = arith.constant dense<0.000000e+00> : vector<16x256xf32>
    %52 = tpu.matmul %49, %51, %cst_22 {dimension_numbers = #tpu.dot_dimension_numbers<[1], [0], [0], [1], [0, 0, 1, 1], [], []>} : vector<16x128xbf16>, vector<128x256xbf16>, vector<16x256xf32> -> vector<16x256xf32>
    %53 = arith.addf %41, %52 : vector<16x256xf32>
    %54 = vector.extract_strided_slice %53 {offsets = [0, 0], sizes = [16, 128], strides = [1, 1]} : vector<16x256xf32> to vector<16x128xf32>
    %55 = vector.extract_strided_slice %53 {offsets = [0, 128], sizes = [16, 128], strides = [1, 1]} : vector<16x256xf32> to vector<16x128xf32>
    %56 = arith.negf %55 : vector<16x128xf32>
    %57 = math.exp %56 : vector<16x128xf32>
    %cst_23 = arith.constant 1.000000e+00 : f32
    %58 = vector.broadcast %cst_23 : f32 to vector<16x128xf32>
    %59 = arith.addf %58, %57 : vector<16x128xf32>
    %60 = arith.divf %58, %59 : vector<16x128xf32>
    %61 = arith.mulf %54, %60 : vector<16x128xf32>
    %62 = arith.addf %3, %61 : vector<16x128xf32>
    %c0_24 = arith.constant 0 : index
    %c0_25 = arith.constant 0 : index
    %c0_26 = arith.constant 0 : index
    %63 = vector.load %arg3[%c0_24, %c0_25, %c0_26] : memref<1x1x128xf32, #tpu.memory_space<vmem>>, vector<1x1x128xf32>
    %64 = vector.shape_cast %63 : vector<1x1x128xf32> to vector<1x128xf32>
    %c0_27 = arith.constant 0 : index
    %c0_28 = arith.constant 0 : index
    %c0_29 = arith.constant 0 : index
    %65 = vector.load %arg4[%c0_27, %c0_28, %c0_29] : memref<1x1x128xf32, #tpu.memory_space<vmem>>, vector<1x1x128xf32>
    %66 = vector.shape_cast %65 : vector<1x1x128xf32> to vector<1x128xf32>
    %cst_30 = arith.constant dense<0.000000e+00> : vector<16xf32>
    %67 = vector.multi_reduction <add>, %62, %cst_30 [1] : vector<16x128xf32> to vector<16xf32>
    %68 = vector.shape_cast %67 : vector<16xf32> to vector<16x1xf32>
    %cst_31 = arith.constant 3.125000e-02 : f32
    %69 = vector.broadcast %cst_31 : f32 to vector<16x1xf32>
    %70 = arith.mulf %68, %69 : vector<16x1xf32>
    %71 = vector.broadcast %70 : vector<16x1xf32> to vector<16x128xf32>
    %72 = arith.subf %62, %71 : vector<16x128xf32>
    %cst_32 = arith.constant 0.000000e+00 : f32
    %73 = vector.shape_cast %23 : vector<1x128xi1> to vector<1x128xi1>
    %74 = vector.broadcast %73 : vector<1x128xi1> to vector<16x128xi1>
    %75 = vector.broadcast %cst_32 : f32 to vector<16x128xf32>
    %76 = arith.select %74, %72, %75 : vector<16x128xi1>, vector<16x128xf32>
    %77 = arith.mulf %76, %76 : vector<16x128xf32>
    %cst_33 = arith.constant dense<0.000000e+00> : vector<16xf32>
    %78 = vector.multi_reduction <add>, %77, %cst_33 [1] : vector<16x128xf32> to vector<16xf32>
    %79 = vector.shape_cast %78 : vector<16xf32> to vector<16x1xf32>
    %cst_34 = arith.constant 3.125000e-02 : f32
    %80 = vector.broadcast %cst_34 : f32 to vector<16x1xf32>
    %81 = arith.mulf %79, %80 : vector<16x1xf32>
    %cst_35 = arith.constant 9.99999974E-6 : f32
    %82 = vector.broadcast %cst_35 : f32 to vector<16x1xf32>
    %83 = arith.addf %81, %82 : vector<16x1xf32>
    %84 = math.rsqrt %83 : vector<16x1xf32>
    %85 = vector.broadcast %84 : vector<16x1xf32> to vector<16x128xf32>
    %86 = arith.mulf %76, %85 : vector<16x128xf32>
    %87 = vector.broadcast %64 : vector<1x128xf32> to vector<16x128xf32>
    %88 = arith.mulf %86, %87 : vector<16x128xf32>
    %89 = vector.broadcast %66 : vector<1x128xf32> to vector<16x128xf32>
    %90 = arith.addf %88, %89 : vector<16x128xf32>
    %91 = arith.truncf %90 : vector<16x128xf32> to vector<16x128xbf16>
    %c0_36 = arith.constant 0 : index
    %c0_37 = arith.constant 0 : index
    %c0_38 = arith.constant 0 : index
    %92 = vector.load %arg5[%c0_36, %c0_37, %c0_38] : memref<1x128x128xbf16, #tpu.memory_space<vmem>>, vector<1x128x128xbf16>
    %93 = vector.shape_cast %92 : vector<1x128x128xbf16> to vector<128x128xbf16>
    %cst_39 = arith.constant dense<0.000000e+00> : vector<16x128xf32>
    %94 = tpu.matmul %91, %93, %cst_39 {dimension_numbers = #tpu.dot_dimension_numbers<[1], [0], [0], [1], [0, 0, 1, 1], [], []>} : vector<16x128xbf16>, vector<128x128xbf16>, vector<16x128xf32> -> vector<16x128xf32>
    %c0_40 = arith.constant 0 : index
    %c0_41 = arith.constant 0 : index
    %c0_42 = arith.constant 0 : index
    %95 = vector.load %arg6[%c0_40, %c0_41, %c0_42] : memref<1x1x128xf32, #tpu.memory_space<vmem>>, vector<1x1x128xf32>
    %96 = vector.shape_cast %95 : vector<1x1x128xf32> to vector<1x128xf32>
    %97 = vector.broadcast %96 : vector<1x128xf32> to vector<16x128xf32>
    %98 = arith.addf %94, %97 : vector<16x128xf32>
    %cst_43 = arith.constant 0.000000e+00 : f32
    %99 = vector.broadcast %cst_43 : f32 to vector<16x128xf32>
    %100 = arith.maximumf %98, %99 : vector<16x128xf32>
    %101 = arith.truncf %100 : vector<16x128xf32> to vector<16x128xbf16>
    %c0_44 = arith.constant 0 : index
    %c0_45 = arith.constant 0 : index
    %c0_46 = arith.constant 0 : index
    %102 = vector.load %arg7[%c0_44, %c0_45, %c0_46] : memref<1x128x128xbf16, #tpu.memory_space<vmem>>, vector<1x128x128xbf16>
    %103 = vector.shape_cast %102 : vector<1x128x128xbf16> to vector<128x128xbf16>
    %cst_47 = arith.constant dense<0.000000e+00> : vector<16x128xf32>
    %104 = tpu.matmul %101, %103, %cst_47 {dimension_numbers = #tpu.dot_dimension_numbers<[1], [0], [0], [1], [0, 0, 1, 1], [], []>} : vector<16x128xbf16>, vector<128x128xbf16>, vector<16x128xf32> -> vector<16x128xf32>
    %c0_48 = arith.constant 0 : index
    %c0_49 = arith.constant 0 : index
    %c0_50 = arith.constant 0 : index
    %105 = vector.load %arg8[%c0_48, %c0_49, %c0_50] : memref<1x1x128xf32, #tpu.memory_space<vmem>>, vector<1x1x128xf32>
    %106 = vector.shape_cast %105 : vector<1x1x128xf32> to vector<1x128xf32>
    %107 = vector.broadcast %106 : vector<1x128xf32> to vector<16x128xf32>
    %108 = arith.addf %104, %107 : vector<16x128xf32>
    %109 = arith.addf %90, %108 : vector<16x128xf32>
    %c0_51 = arith.constant 0 : index
    %c0_52 = arith.constant 0 : index
    %c0_53 = arith.constant 0 : index
    %110 = vector.load %arg9[%c0_51, %c0_52, %c0_53] : memref<1x1x128xf32, #tpu.memory_space<vmem>>, vector<1x1x128xf32>
    %111 = vector.shape_cast %110 : vector<1x1x128xf32> to vector<1x128xf32>
    %c0_54 = arith.constant 0 : index
    %c0_55 = arith.constant 0 : index
    %c0_56 = arith.constant 0 : index
    %112 = vector.load %arg10[%c0_54, %c0_55, %c0_56] : memref<1x1x128xf32, #tpu.memory_space<vmem>>, vector<1x1x128xf32>
    %113 = vector.shape_cast %112 : vector<1x1x128xf32> to vector<1x128xf32>
    %cst_57 = arith.constant dense<0.000000e+00> : vector<16xf32>
    %114 = vector.multi_reduction <add>, %109, %cst_57 [1] : vector<16x128xf32> to vector<16xf32>
    %115 = vector.shape_cast %114 : vector<16xf32> to vector<16x1xf32>
    %cst_58 = arith.constant 3.125000e-02 : f32
    %116 = vector.broadcast %cst_58 : f32 to vector<16x1xf32>
    %117 = arith.mulf %115, %116 : vector<16x1xf32>
    %118 = vector.broadcast %117 : vector<16x1xf32> to vector<16x128xf32>
    %119 = arith.subf %109, %118 : vector<16x128xf32>
    %cst_59 = arith.constant 0.000000e+00 : f32
    %120 = vector.shape_cast %23 : vector<1x128xi1> to vector<1x128xi1>
    %121 = vector.broadcast %120 : vector<1x128xi1> to vector<16x128xi1>
    %122 = vector.broadcast %cst_59 : f32 to vector<16x128xf32>
    %123 = arith.select %121, %119, %122 : vector<16x128xi1>, vector<16x128xf32>
    %124 = arith.mulf %123, %123 : vector<16x128xf32>
    %cst_60 = arith.constant dense<0.000000e+00> : vector<16xf32>
    %125 = vector.multi_reduction <add>, %124, %cst_60 [1] : vector<16x128xf32> to vector<16xf32>
    %126 = vector.shape_cast %125 : vector<16xf32> to vector<16x1xf32>
    %cst_61 = arith.constant 3.125000e-02 : f32
    %127 = vector.broadcast %cst_61 : f32 to vector<16x1xf32>
    %128 = arith.mulf %126, %127 : vector<16x1xf32>
    %cst_62 = arith.constant 9.99999974E-6 : f32
    %129 = vector.broadcast %cst_62 : f32 to vector<16x1xf32>
    %130 = arith.addf %128, %129 : vector<16x1xf32>
    %131 = math.rsqrt %130 : vector<16x1xf32>
    %132 = vector.broadcast %131 : vector<16x1xf32> to vector<16x128xf32>
    %133 = arith.mulf %123, %132 : vector<16x128xf32>
    %134 = vector.broadcast %111 : vector<1x128xf32> to vector<16x128xf32>
    %135 = arith.mulf %133, %134 : vector<16x128xf32>
    %136 = vector.broadcast %113 : vector<1x128xf32> to vector<16x128xf32>
    %137 = arith.addf %135, %136 : vector<16x128xf32>
    %c0_63 = arith.constant 0 : index
    %c0_64 = arith.constant 0 : index
    %138 = vector.load %arg11[%c0_63, %c0_64] : memref<16x128xf32, #tpu.memory_space<vmem>>, vector<16x128xf32>
    tpu.vector_store %arg11[%c0_63, %c0_64], %137 {strides = array<i32>} : memref<16x128xf32, #tpu.memory_space<vmem>>, vector<16x128xf32>,
    return
  }
  func.func @transform_0(%arg0: i32) -> (i32, i32) {
    %c0_i32 = arith.constant 0 : i32
    %c0_i32_0 = arith.constant 0 : i32
    %c0_i32_1 = arith.constant 0 : i32
    return %c0_i32, %c0_i32_0 : i32, i32
  }
  func.func @transform_1(%arg0: i32) -> (i32, i32, i32, i32) {
    %c0_i32 = arith.constant 0 : i32
    %c0_i32_0 = arith.constant 0 : i32
    %c0_i32_1 = arith.constant 0 : i32
    %c0_i32_2 = arith.constant 0 : i32
    return %arg0, %c0_i32, %c0_i32_0, %c0_i32_1 : i32, i32, i32, i32
  }
  func.func @transform_2(%arg0: i32) -> (i32, i32, i32) {
    %c0_i32 = arith.constant 0 : i32
    %c0_i32_0 = arith.constant 0 : i32
    %c0_i32_1 = arith.constant 0 : i32
    return %arg0, %c0_i32, %c0_i32_0 : i32, i32, i32
  }
  func.func @transform_3(%arg0: i32) -> (i32, i32, i32) {
    %c0_i32 = arith.constant 0 : i32
    %c0_i32_0 = arith.constant 0 : i32
    %c0_i32_1 = arith.constant 0 : i32
    return %arg0, %c0_i32, %c0_i32_0 : i32, i32, i32
  }
  func.func @transform_4(%arg0: i32) -> (i32, i32, i32) {
    %c0_i32 = arith.constant 0 : i32
    %c0_i32_0 = arith.constant 0 : i32
    %c0_i32_1 = arith.constant 0 : i32
    return %arg0, %c0_i32, %c0_i32_0 : i32, i32, i32
  }
  func.func @transform_5(%arg0: i32) -> (i32, i32, i32) {
    %c0_i32 = arith.constant 0 : i32
    %c0_i32_0 = arith.constant 0 : i32
    %c0_i32_1 = arith.constant 0 : i32
    return %arg0, %c0_i32, %c0_i32_0 : i32, i32, i32
  }
  func.func @transform_6(%arg0: i32) -> (i32, i32, i32) {
    %c0_i32 = arith.constant 0 : i32
    %c0_i32_0 = arith.constant 0 : i32
    %c0_i32_1 = arith.constant 0 : i32
    return %arg0, %c0_i32, %c0_i32_0 : i32, i32, i32
  }
  func.func @transform_7(%arg0: i32) -> (i32, i32, i32) {
    %c0_i32 = arith.constant 0 : i32
    %c0_i32_0 = arith.constant 0 : i32
    %c0_i32_1 = arith.constant 0 : i32
    return %arg0, %c0_i32, %c0_i32_0 : i32, i32, i32
  }
  func.func @transform_8(%arg0: i32) -> (i32, i32, i32) {
    %c0_i32 = arith.constant 0 : i32
    %c0_i32_0 = arith.constant 0 : i32
    %c0_i32_1 = arith.constant 0 : i32
    return %arg0, %c0_i32, %c0_i32_0 : i32, i32, i32
  }
  func.func @transform_9(%arg0: i32) -> (i32, i32, i32) {
    %c0_i32 = arith.constant 0 : i32
    %c0_i32_0 = arith.constant 0 : i32
    %c0_i32_1 = arith.constant 0 : i32
    return %arg0, %c0_i32, %c0_i32_0 : i32, i32, i32
  }
  func.func @transform_10(%arg0: i32) -> (i32, i32) {
    %c0_i32 = arith.constant 0 : i32
    %c0_i32_0 = arith.constant 0 : i32
    %c0_i32_1 = arith.constant 0 : i32
    return %c0_i32, %c0_i32_0 : i32, i32
  }
}

</mosaic_0001>

<bundles_post_ra>
// kernel: stack_gated_cnn.1
= control target key start
LH: loop header
LB: loop body
LE: loop exit
PB: predicated region body
PF: predicated region fallthrough
CT: control target
= control target key end

     0   :  { %s1774_s13 = smov 0   ;;  %s2000_s0 = inlined_call_operand.vmem [shape: f32[16,128], index: 0, kind: input, shape index: {}]   ;;  %s2001_s1 = inlined_call_operand.vmem [shape: bf16[2,3,128,256], index: 1, kind: input, shape index: {}]   ;;  %s2002_s2 = inlined_call_operand.vmem [shape: f32[2,1,128], index: 2, kind: input, shape index: {}]   ;;  %s2003_s3 = inlined_call_operand.vmem [shape: f32[2,1,128], index: 3, kind: input, shape index: {}]   ;;  %s2004_s4 = inlined_call_operand.vmem [shape: bf16[2,128,128], index: 4, kind: input, shape index: {}]   ;;  %s2005_s5 = inlined_call_operand.vmem [shape: f32[2,1,128], index: 5, kind: input, shape index: {}]   ;;  %s2006_s6 = inlined_call_operand.vmem [shape: bf16[2,128,128], index: 6, kind: input, shape index: {}]   ;;  %s2007_s7 = inlined_call_operand.vmem [shape: f32[2,1,128], index: 7, kind: input, shape index: {}]   ;;  %s2008_s8 = inlined_call_operand.vmem [shape: f32[2,1,128], index: 8, kind: input, shape index: {}]   ;;  %s2009_s9 = inlined_call_operand.vmem [shape: f32[2,1,128], index: 9, kind: input, shape index: {}]   ;;  %s2010_s10 = inlined_call_operand.vmem [shape: f32[16,128], index: 10, kind: output, shape index: {}]  }
   0x1   :  { %2011 = sst [smem:[#allocation2_spill]] %s2001_s1 }
   0x2 LB: > { %s1402_s14 = sadd.s32 4294967295, %s1714_s13   ;;  %p1405_p0 = scmp.ge.s32.totalorder %s1714_s13, 1  ;;  %s1714_s13 = sphi %s1774_s13, %s20_s13  }
   0x3   : > { %p375_p1 = scmp.lt.s32.totalorder %s1714_s13, 3 }
   0x5   : > { %p376_p2 = pnand %p1405_p0, %p375_p1 }
   0x6   : > { %p436_p3 = scmp.lt.s32.totalorder (!%p376_p2), %s1402_s14, 1  ;;  %s2012_s1 = sld [smem:[#allocation2_spill]] (!%p376_p2) }
   0x7   : > { %379 = sbr.rel (%p376_p2) target bundleno = 1431 (0x597), region = 60  ;;  %p1411_p4 = scmp.ne.s32.totalorder (!%p376_p2), %s1402_s14, 0 }
   0xe   : > { %s1782_s15 = scalar_select %p436_p3, %s1402_s14, 1 }
   0xf   : > { %473 = sbr.rel (%p1411_p4) target bundleno = 22 (0x16), region = 64  ;;  %v474_v0 = vld [vmem:[%s2000_s0] sm:$0xff] (!%p1411_p4)  ;;  %v475_v1 = vld [vmem:[%s2000_s0 + $0x8] sm:$0xff] (!%p1411_p4) }
  0x10   : > { %s1592_s16 = smul.u32 384, %s1782_s15  ;;  %s1524_s23 = sshll.u32 %s1782_s15, 6  ;;  %476 = vst [vmem:[%s2010_s10] sm:$0xff] (!%p1411_p4), %v474_v0  ;;  %477 = vst [vmem:[%s2010_s10 + $0x8] sm:$0xff] (!%p1411_p4), %v475_v1 }
  0x11   : > { %s1802_s29 = scalar_lea.vmem %s2004_s4, %s1524_s23  ;;  %s454_s12 = scalar_lea.vmem %s2005_s5, %s1782_s15 }
  0x12   : > { %s1797_s26 = scalar_lea.vmem %s2012_s1, %s1592_s16  ;;  %s1811_s20 = scalar_lea.vmem %s2006_s6, %s1524_s23 }
  0x13   : > { %s462_s24 = scalar_lea.vmem %s2007_s7, %s1782_s15  ;;  %s465_s19 = scalar_lea.vmem %s2008_s8, %s1782_s15 }
  0x14   : > { %s468_s1 = scalar_lea.vmem %s2009_s9, %s1782_s15 }
  0x16 PF: > { %v1604_v2 = vld [vmem:[%s1797_s26 + $0x84] ss:$8 sps:$4 sm:$0xff]   ;;  %v1606_v3 = vld [vmem:[%s1797_s26 + $0x80] ss:$8 sps:$4 sm:$0xff]   ;;  %v1716_v4 = vmov 0   ;;  %v480_v31 = vlaneseq  ;;  %vm1718_vm9 = vmmov 0   ;;  %s2013_s30 = scalar_lea.vmem %s2002_s2, %s1782_s15  ;;  %s2014_s17 = scalar_lea.vmem %s2003_s3, %s1782_s15 }
  0x17   : > { %670 = vmatprep.mubr.bf16.mxu0 %v1716_v4  ;;  %638 = vmatprep.subr.bf16.mxu0 %v1604_v2  ;;  %v1607_v5 = vld [vmem:[%s1797_s26 + $0x94] ss:$8 sps:$4 sm:$0xff]   ;;  %v1609_v6 = vld [vmem:[%s1797_s26 + $0x90] ss:$8 sps:$4 sm:$0xff]   ;;  %v1610_v7 = vld [vmem:[%s1797_s26 + $0xa4] ss:$8 sps:$4 sm:$0xff]  }
  0x18   : > { %639 = vmatpush1.bf16.msra.mxu0 %v1606_v3  ;;  %v1612_v8 = vld [vmem:[%s1797_s26 + $0xa0] ss:$8 sps:$4 sm:$0xff]   ;;  %v1613_v9 = vld [vmem:[%s1797_s26 + $0xb4] ss:$8 sps:$4 sm:$0xff]   ;;  %v1615_v10 = vld [vmem:[%s1797_s26 + $0xb0] ss:$8 sps:$4 sm:$0xff]  }
  0x19   : > { %640 = vmatprep.subr.bf16.mxu0 %v1607_v5  ;;  %v1616_v11 = vld [vmem:[%s1797_s26 + $0xc4] ss:$8 sps:$4 sm:$0xff]   ;;  %v1618_v12 = vld [vmem:[%s1797_s26 + $0xc0] ss:$8 sps:$4 sm:$0xff]   ;;  %v1619_v13 = vld [vmem:[%s1797_s26 + $0xd4] ss:$8 sps:$4 sm:$0xff]  }
  0x1a   : > { %v1621_v14 = vld [vmem:[%s1797_s26 + $0xd0] ss:$8 sps:$4 sm:$0xff]   ;;  %v1622_v15 = vld [vmem:[%s1797_s26 + $0xe4] ss:$8 sps:$4 sm:$0xff]   ;;  %v1624_v16 = vld [vmem:[%s1797_s26 + $0xe0] ss:$8 sps:$4 sm:$0xff]  }
  0x1b   : > { %v1625_v17 = vld [vmem:[%s1797_s26 + $0xf4] ss:$8 sps:$4 sm:$0xff]   ;;  %v1627_v18 = vld [vmem:[%s1797_s26 + $0xf0] ss:$8 sps:$4 sm:$0xff]   ;;  %v1857_v19 = vld [vmem:[%s2010_s10] sm:$0xff]  ;;  %v1879_v34 = vshrl.u32 %v480_v31, 7 }
  0x1c   : > { %641 = vmatpush1.bf16.msra.mxu0 %v1609_v6  ;;  %v1862_v20 = vld [vmem:[%s2010_s10 + $0x8] sm:$0xff]  ;;  %v1633_v24 = vld [vmem:[%s1797_s26 + $0x14] ss:$8 sps:$4 sm:$0xff]   ;;  %v1631_v25 = vld [vmem:[%s1797_s26 + $0x10] ss:$8 sps:$4 sm:$0xff]   ;;  %v510_v38 = vrot.slane %v1857_v19, 7 }
  0x1d   : > { %642 = vmatprep.subr.bf16.mxu0 %v1610_v7  ;;  %v1630_v21 = vld [vmem:[%s1797_s26 + $0x4] ss:$8 sps:$4 sm:$0xff]   ;;  %v540_v22 = vpack.c.bf16 %v1862_v20, %v1857_v19  ;;  %v1628_v23 = vld [vmem:[%s1797_s26] ss:$8 sps:$4 sm:$0xff]   ;;  %v1639_v28 = vld [vmem:[%s1797_s26 + $0x34] ss:$8 sps:$4 sm:$0xff]  }
  0x1e   : > { %v1636_v26 = vld [vmem:[%s1797_s26 + $0x24] ss:$8 sps:$4 sm:$0xff]   ;;  %v1634_v27 = vld [vmem:[%s1797_s26 + $0x20] ss:$8 sps:$4 sm:$0xff]   ;;  %v1637_v29 = vld [vmem:[%s1797_s26 + $0x30] ss:$8 sps:$4 sm:$0xff]  }
  0x1f   : > { %v1642_v30 = vld [vmem:[%s1797_s26 + $0x44] ss:$8 sps:$4 sm:$0xff]   ;;  %v1640_v32 = vld [vmem:[%s1797_s26 + $0x40] ss:$8 sps:$4 sm:$0xff]   ;;  %v1645_v33 = vld [vmem:[%s1797_s26 + $0x54] ss:$8 sps:$4 sm:$0xff]  }
  0x20   : > { %643 = vmatpush1.bf16.msra.mxu0 %v1612_v8  ;;  %v1643_v35 = vld [vmem:[%s1797_s26 + $0x50] ss:$8 sps:$4 sm:$0xff]   ;;  %v1648_v36 = vld [vmem:[%s1797_s26 + $0x64] ss:$8 sps:$4 sm:$0xff]   ;;  %v482_v37 = vadd.s32 8, %v1879_v34  ;;  %v511_v39 = vrot.slane %v1862_v20, 7 }
  0x21   : > { %644 = vmatprep.subr.bf16.mxu0 %v1613_v9  ;;  %v1646_v40 = vld [vmem:[%s1797_s26 + $0x60] ss:$8 sps:$4 sm:$0xff]   ;;  %v1651_v41 = vld [vmem:[%s1797_s26 + $0x74] ss:$8 sps:$4 sm:$0xff]   ;;  %v487_v42 = vand.u32 7, %v1879_v34  ;;  %vm512_vm0 = vcmp.lt.s32.totalorder %v1879_v34, 1 }
  0x22   : > { %v494_v43 = vand.u32 7, %v482_v37  ;;  %v1649_v44 = vld [vmem:[%s1797_s26 + $0x70] ss:$8 sps:$4 sm:$0xff]   ;;  %v513_v45 = vsel %vm512_vm0, %v510_v38, %v511_v39  ;;  %v514_v46 = vsel %vm512_vm0, %v511_v39, %v510_v38  ;;  %v1654_v47 = vld [vmem:[%s1797_s26 + $0x104] ss:$8 sps:$4 sm:$0xff]   ;;  %v804_v61 = vrot.slane %v1857_v19, 1 }
  0x23   : > { %vm515_vm1 = vcmp.ge.s32.totalorder %v487_v42, 1  ;;  %v1461_v48 = vpack.c.bf16 %v513_v45, %v514_v46  ;;  %v1652_v49 = vld [vmem:[%s1797_s26 + $0x100] ss:$8 sps:$4 sm:$0xff]   ;;  %v1657_v50 = vld [vmem:[%s1797_s26 + $0x114] ss:$8 sps:$4 sm:$0xff]   ;;  %v805_v62 = vrot.slane %v1862_v20, 1 }
  0x24   : > { %645 = vmatpush1.bf16.msra.mxu0 %v1615_v10  ;;  %vm516_vm2 = vcmp.ge.s32.totalorder %v494_v43, 1  ;;  %v1655_v51 = vld [vmem:[%s1797_s26 + $0x110] ss:$8 sps:$4 sm:$0xff]   ;;  %v1660_v52 = vld [vmem:[%s1797_s26 + $0x124] ss:$8 sps:$4 sm:$0xff]   ;;  %vm806_vm4 = vcmp.lt.s32.totalorder %v1879_v34, 7 }
  0x25   : > { %646 = vmatprep.subr.bf16.mxu0 %v1616_v11  ;;  %vm1460_vm3 = vmpackc.low %vm516_vm2, %vm515_vm1  ;;  %v1658_v53 = vld [vmem:[%s1797_s26 + $0x120] ss:$8 sps:$4 sm:$0xff]   ;;  %v1663_v54 = vld [vmem:[%s1797_s26 + $0x134] ss:$8 sps:$4 sm:$0xff]   ;;  %v807_v2 = vsel %vm806_vm4, %v804_v61, %v805_v62  ;;  %v808_v3 = vsel %vm806_vm4, %v805_v62, %v804_v61  ;;  %vm809_vm5 = vcmp.lt.s32.totalorder %v487_v42, 7  ;;  %vm810_vm6 = vcmp.lt.s32.totalorder %v494_v43, 7 }
  0x26   : > { %v1661_v55 = vld [vmem:[%s1797_s26 + $0x130] ss:$8 sps:$4 sm:$0xff]   ;;  %v1666_v56 = vld [vmem:[%s1797_s26 + $0x144] ss:$8 sps:$4 sm:$0xff]   ;;  %v1664_v57 = vld [vmem:[%s1797_s26 + $0x140] ss:$8 sps:$4 sm:$0xff]  }
  0x27   : > { %v1669_v58 = vld [vmem:[%s1797_s26 + $0x154] ss:$8 sps:$4 sm:$0xff]   ;;  %v1667_v59 = vld [vmem:[%s1797_s26 + $0x150] ss:$8 sps:$4 sm:$0xff]   ;;  %v1672_v60 = vld [vmem:[%s1797_s26 + $0x164] ss:$8 sps:$4 sm:$0xff]  }
  0x28   : > { %647 = vmatpush1.bf16.msra.mxu0 %v1618_v12  ;;  %v1670_v63 = vld [vmem:[%s1797_s26 + $0x160] ss:$8 sps:$4 sm:$0xff]   ;;  %v1675_v0 = vld [vmem:[%s1797_s26 + $0x174] ss:$8 sps:$4 sm:$0xff]   ;;  %v1673_v1 = vld [vmem:[%s1797_s26 + $0x170] ss:$8 sps:$4 sm:$0xff]  }
  0x29   : > { %648 = vmatprep.subr.bf16.mxu0 %v1619_v13  ;;  %vm1495_vm7 = vmpackc.low %vm810_vm6, %vm809_vm5  ;;  %v1677_v34 = vld [vmem:[%s1802_s29 + $0x8] sm:$0xff]   ;;  %v1680_v37 = vld [vmem:[%s1802_s29 + $0x20] sm:$0xff]  }
  0x2a   : > { %v1681_v38 = vld [vmem:[%s1802_s29 + $0x28] sm:$0xff]   ;;  %v1682_v39 = vld [vmem:[%s1802_s29 + $0x30] sm:$0xff]   ;;  %v1687_v61 = vld [vmem:[%s1811_s20 + $0x18] sm:$0xff]  }
  0x2b   : > { %v1688_v62 = vld [vmem:[%s1811_s20 + $0x20] sm:$0xff]  }
  0x2c   : > { %649 = vmatpush1.bf16.msra.mxu0 %v1621_v14 }
  0x2d   : > { %650 = vmatprep.subr.bf16.mxu0 %v1622_v15 }
  0x30   : > { %651 = vmatpush1.bf16.msra.mxu0 %v1624_v16 }
  0x31   : > { %652 = vmatprep.subr.bf16.mxu0 %v1625_v17 }
  0x34   : > { %653 = vmatpush1.bf16.msra.mxu0 %v1627_v18 }
  0x35   : > { %761 = vmatprep.subr.bf16.mxu0 %v1630_v21 }
  0x37   : > { %671 = vmatmul.mubr.bf16.vlgmr.msra.gmra.mrb[0].mxu0 %v540_v22 }
  0x38   : > { %762 = vmatpush1.bf16.msra.mxu0 %v1628_v23  ;;  %793 = vmatprep.mubr.bf16.mxu0 %v1716_v4  ;;  %v1676_v23 = vld [vmem:[%s1802_s29] sm:$0xff]  }
  0x39   : > { %763 = vmatprep.subr.bf16.mxu0 %v1633_v24  ;;  %v1717_v24 = vmov 0.0  }
  0x3a   : > { %1544 = vmatprep.subr.bf16.mxu1 %v1717_v24  ;;  %1560 = vmatprep.mubr.msk.bf16.mxu1 %vm1718_vm9, %v1717_v24 }
  0x3b   : > { %1545 = vmatpush3.bf16.msra.mxu1 %v1676_v23 }
  0x3c   : > { %764 = vmatpush1.bf16.msra.mxu0 %v1631_v25  ;;  %1546 = vmatprep.subr.bf16.mxu1 %v1717_v24  ;;  %v1917_v25 = vand.u32 127, %v480_v31 }
  0x3d   : > { %765 = vmatprep.subr.bf16.mxu0 %v1636_v26 }
  0x3e   : > { %vm509_vm8 = vcmp.lt.s32.totalorder %v1917_v25, 32 }
  0x3f   : > { %1547 = vmatpush3.bf16.msra.mxu1 %v1677_v34 }
  0x40   : > { %766 = vmatpush1.bf16.msra.mxu0 %v1634_v27  ;;  %1548 = vmatprep.subr.bf16.mxu1 %v1717_v24 }
  0x41   : > { %767 = vmatprep.subr.bf16.mxu0 %v1639_v28 }
  0x44   : > { %768 = vmatpush1.bf16.msra.mxu0 %v1637_v29 }
  0x45   : > { %769 = vmatprep.subr.bf16.mxu0 %v1642_v30 }
  0x48   : > { %770 = vmatpush1.bf16.msra.mxu0 %v1640_v32 }
  0x49   : > { %771 = vmatprep.subr.bf16.mxu0 %v1645_v33 }
  0x4c   : > { %772 = vmatpush1.bf16.msra.mxu0 %v1643_v35  ;;  %v1678_v35 = vld [vmem:[%s1802_s29 + $0x10] sm:$0xff]  }
  0x4d   : > { %773 = vmatprep.subr.bf16.mxu0 %v1648_v36  ;;  %1549 = vmatpush3.bf16.msra.mxu1 %v1678_v35  ;;  %v1679_v36 = vld [vmem:[%s1802_s29 + $0x18] sm:$0xff]  }
  0x4e   : > { %1550 = vmatprep.subr.bf16.mxu1 %v1717_v24 }
  0x50   : > { %774 = vmatpush1.bf16.msra.mxu0 %v1646_v40  ;;  %v1683_v40 = vld [vmem:[%s1802_s29 + $0x38] sm:$0xff]  }
  0x51   : > { %775 = vmatprep.subr.bf16.mxu0 %v1651_v41  ;;  %1551 = vmatpush3.bf16.msra.mxu1 %v1679_v36 }
  0x52   : > { %1552 = vmatprep.subr.bf16.mxu1 %v1717_v24 }
  0x54   : > { %776 = vmatpush1.bf16.msra.mxu0 %v1649_v44 }
  0x55   : > { %915 = vmatprep.subr.bf16.mxu0 %v1654_v47  ;;  %1553 = vmatpush3.bf16.msra.mxu1 %v1680_v37 }
  0x56   : > { %1554 = vmatprep.subr.bf16.mxu1 %v1717_v24 }
  0x57   : > { %1462 = vmatmul.mubr.msk.bf16.vlgmr.msra.gmra.mrb[0].mxu0 %vm1460_vm3, %v1461_v48 }
  0x58   : > { %916 = vmatpush1.bf16.msra.mxu0 %v1652_v49  ;;  %947 = vmatprep.mubr.bf16.mxu0 %v1716_v4  ;;  %v1496_v4 = vpack.c.bf16 %v808_v3, %v807_v2  ;;  %v1500_v49 = vld [vmem:[%s2013_s30] ss:$0 sm:$0xff] }
  0x59   : > { %917 = vmatprep.subr.bf16.mxu0 %v1657_v50  ;;  %1555 = vmatpush3.bf16.msra.mxu1 %v1681_v38  ;;  %v1502_v2 = vld [vmem:[%s454_s12] ss:$0 sm:$0xff] }
  0x5a   : > { %1556 = vmatprep.subr.bf16.mxu1 %v1717_v24 }
  0x5c   : > { %918 = vmatpush1.bf16.msra.mxu0 %v1655_v51 }
  0x5d   : > { %919 = vmatprep.subr.bf16.mxu0 %v1660_v52  ;;  %1557 = vmatpush3.bf16.msra.mxu1 %v1682_v39  ;;  %v1520_v39 = vld [vmem:[%s465_s19] ss:$0 sm:$0xff] }
  0x5e   : > { %1558 = vmatprep.subr.bf16.mxu1 %v1717_v24 }
  0x60   : > { %920 = vmatpush1.bf16.msra.mxu0 %v1658_v53  ;;  %v1501_v53 = vld [vmem:[%s2014_s17] ss:$0 sm:$0xff] }
  0x61   : > { %921 = vmatprep.subr.bf16.mxu0 %v1663_v54  ;;  %1559 = vmatpush3.bf16.msra.mxu1 %v1683_v40 }
  0x62   : > { %1564 = vmatprep.subr.bf16.mxu1 %v1717_v24 }
  0x64   : > { %922 = vmatpush1.bf16.msra.mxu0 %v1661_v55 }
  0x65   : > { %923 = vmatprep.subr.bf16.mxu0 %v1666_v56 }
  0x68   : > { %924 = vmatpush1.bf16.msra.mxu0 %v1664_v57  ;;  %v1684_v57 = vld [vmem:[%s1811_s20] sm:$0xff]  }
  0x69   : > { %925 = vmatprep.subr.bf16.mxu0 %v1669_v58 }
  0x6c   : > { %926 = vmatpush1.bf16.msra.mxu0 %v1667_v59  ;;  %v1685_v59 = vld [vmem:[%s1811_s20 + $0x8] sm:$0xff]  }
  0x6d   : > { %927 = vmatprep.subr.bf16.mxu0 %v1672_v60  ;;  %v1686_v60 = vld [vmem:[%s1811_s20 + $0x10] sm:$0xff]  }
  0x70   : > { %928 = vmatpush1.bf16.msra.mxu0 %v1670_v63  ;;  %v1689_v63 = vld [vmem:[%s1811_s20 + $0x28] sm:$0xff]  }
  0x71   : > { %929 = vmatprep.subr.bf16.mxu0 %v1675_v0  ;;  %v1690_v0 = vld [vmem:[%s1811_s20 + $0x30] sm:$0xff]  }
  0x74   : > { %930 = vmatpush1.bf16.msra.mxu0 %v1673_v1  ;;  %v1691_v1 = vld [vmem:[%s1811_s20 + $0x38] sm:$0xff]  }
  0x77   : > { %1497 = vmatmul.mubr.msk.bf16.vlgmr.msra.gmra.mrb[0].mxu0 %vm1495_vm7, %v1496_v4 }
 0x14a   : > { %v949_v5 = vpop.f32.mrb[0].mxu0 }
 0x14b   : > { %v951_v6 = vpop.f32.mrb[1].mxu0 }
 0x14c   : > { %v1498_v7 = vmul.f32 -1.442695, %v951_v6  ;;  %v953_v8 = vpop.f32.mrb[2].mxu0 }
 0x14d   : > { %v955_v9 = vpop.f32.mrb[3].mxu0 }
 0x14e   : > { %1692 = vpow2.f32 %v1498_v7  ;;  %v1499_v10 = vmul.f32 -1.442695, %v955_v9 }
 0x150   : > { %1694 = vpow2.f32 %v1499_v10 }
 0x158   : > { %v1693_v11 = vpop.eup %1692 }
 0x159   : > { %v968_v12 = vadd.f32 1.0, %v1693_v11 }
 0x15a   : > { %v1695_v13 = vpop.eup %1694 }
 0x15b   : > { %1696 = vrcp.f32 %v968_v12  ;;  %v969_v14 = vadd.f32 1.0, %v1695_v13  ;;  %v1511_v12 = vld [vmem:[%s462_s24] ss:$0 sm:$0xff] }
 0x15d   : > { %1698 = vrcp.f32 %v969_v14 }
 0x165   : > { %v1697_v15 = vpop.eup %1696 }
 0x166   : > { %v974_v16 = vmul.f32 %v1697_v15, %v949_v5 }
 0x167   : > { %v1699_v17 = vpop.eup %1698 }
 0x168   : > { %v976_v18 = vadd.f32 %v974_v16, %v1857_v19  ;;  %v975_v21 = vmul.f32 %v1699_v17, %v953_v8 }
 0x16a   : > { %980 = vadd.xlane.f32.xlu0 %v976_v18  ;;  %v977_v22 = vadd.f32 %v975_v21, %v1862_v20 }
 0x16e   : > { %982 = vadd.xlane.f32.xlu0 %v977_v22 }
 0x1f7   : > { %v981_v26 = vpop.xlane.xlu0 %980 }
 0x1f8   : > { %v984_v27 = vmul.f32 0.03125, %v981_v26 }
 0x1fa   : > { %v986_v19 = vsub.f32 %v976_v18, %v984_v27 }
 0x1fb   : > { %v983_v20 = vpop.xlane.xlu0 %982 }
 0x1fc   : > { %v985_v28 = vmul.f32 0.03125, %v983_v20  ;;  %v990_v29 = vsel %vm509_vm8, %v986_v19, 0.0 }
 0x1fd   : > { %v992_v30 = vmul.f32 %v990_v29, %v990_v29 }
 0x1fe   : > { %v987_v32 = vsub.f32 %v977_v22, %v985_v28 }
 0x1ff   : > { %994 = vadd.xlane.f32.xlu1 %v992_v30 }
 0x200   : > { %v991_v31 = vsel %vm509_vm8, %v987_v32, 0.0 }
 0x201   : > { %v993_v33 = vmul.f32 %v991_v31, %v991_v31 }
 0x203   : > { %996 = vadd.xlane.f32.xlu1 %v993_v33 }
 0x28c   : > { %v995_v41 = vpop.xlane.xlu1 %994 }
 0x28d   : > { %v998_v42 = vmul.f32 0.03125, %v995_v41  ;;  %v1521_v41 = vld [vmem:[%s468_s1] ss:$0 sm:$0xff] }
 0x28f   : > { %v1000_v43 = vadd.f32 1e-05, %v998_v42 }
 0x290   : > { %v997_v44 = vpop.xlane.xlu1 %996 }
 0x291   : > { %1700 = vrsqrt.f32 %v1000_v43  ;;  %v999_v45 = vmul.f32 0.03125, %v997_v44 }
 0x293   : > { %v1001_v46 = vadd.f32 1e-05, %v999_v45 }
 0x295   : > { %1702 = vrsqrt.f32 %v1001_v46 }
 0x29b   : > { %v1701_v47 = vpop.eup %1700 }
 0x29c   : > { %v1004_v48 = vmul.f32 %v1701_v47, %v990_v29 }
 0x29e   : > { %v1012_v52 = vmul.f32 %v1500_v49, %v1004_v48 }
 0x29f   : > { %v1703_v50 = vpop.eup %1702 }
 0x2a0   : > { %v1005_v51 = vmul.f32 %v1703_v50, %v991_v31  ;;  %v1020_v55 = vadd.f32 %v1501_v53, %v1012_v52 }
 0x2a2   : > { %v1013_v54 = vmul.f32 %v1500_v49, %v1005_v51 }
 0x2a4   : > { %v1021_v56 = vadd.f32 %v1501_v53, %v1013_v54 }
 0x2a6   : > { %v1022_v58 = vpack.c.bf16 %v1021_v56, %v1020_v55 }
 0x2a8   : > { %1561 = vmatmul.mubr.bf16.vlgmr.msra.gmra.mrb[0].mxu1 %v1022_v58 }
 0x2a9   : > { %1565 = vmatpush3.bf16.msra.mxu1 %v1684_v57  ;;  %1580 = vmatprep.mubr.msk.bf16.mxu1 %vm1718_vm9, %v1717_v24 }
 0x2aa   : > { %1566 = vmatprep.subr.bf16.mxu1 %v1717_v24 }
 0x2ad   : > { %1567 = vmatpush3.bf16.msra.mxu1 %v1685_v59 }
 0x2ae   : > { %1568 = vmatprep.subr.bf16.mxu1 %v1717_v24 }
 0x2b1   : > { %1569 = vmatpush3.bf16.msra.mxu1 %v1686_v60 }
 0x2b2   : > { %1570 = vmatprep.subr.bf16.mxu1 %v1717_v24 }
 0x2b5   : > { %1571 = vmatpush3.bf16.msra.mxu1 %v1687_v61 }
 0x2b6   : > { %1572 = vmatprep.subr.bf16.mxu1 %v1717_v24 }
 0x2b9   : > { %1573 = vmatpush3.bf16.msra.mxu1 %v1688_v62 }
 0x2ba   : > { %1574 = vmatprep.subr.bf16.mxu1 %v1717_v24 }
 0x2bd   : > { %1575 = vmatpush3.bf16.msra.mxu1 %v1689_v63 }
 0x2be   : > { %1576 = vmatprep.subr.bf16.mxu1 %v1717_v24 }
 0x2c1   : > { %1577 = vmatpush3.bf16.msra.mxu1 %v1690_v0 }
 0x2c2   : > { %1578 = vmatprep.subr.bf16.mxu1 %v1717_v24 }
 0x2c5   : > { %1579 = vmatpush3.bf16.msra.mxu1 %v1691_v1 }
 0x37b   : > { %v1128_v3 = vpop.f32.mrb[0].mxu1 }
 0x37c   : > { %v1129_v4 = vadd.f32 %v1502_v2, %v1128_v3  ;;  %v1562_v5 = vpop.f32.mrb[1].mxu1 }
 0x37d   : > { %v1131_v6 = vpop.f32.mrb[2].mxu1 }
 0x37e   : > { %v1132_v7 = vadd.f32 %v1502_v2, %v1131_v6  ;;  %v1563_v8 = vpop.f32.mrb[3].mxu1  ;;  %v1135_v9 = vmax.f32 %v1129_v4, 0.0 }
 0x380   : > { %v1136_v10 = vmax.f32 %v1132_v7, 0.0 }
 0x382   : > { %v1137_v11 = vpack.c.bf16 %v1136_v10, %v1135_v9 }
 0x384   : > { %1581 = vmatmul.mubr.bf16.vlgmr.msra.gmra.mrb[4].mxu1 %v1137_v11 }
 0x457   : > { %v1243_v13 = vpop.f32.mrb[4].mxu1 }
 0x458   : > { %v1244_v14 = vadd.f32 %v1511_v12, %v1243_v13  ;;  %v1582_v15 = vpop.f32.mrb[5].mxu1 }
 0x459   : > { %v1246_v16 = vpop.f32.mrb[6].mxu1 }
 0x45a   : > { %v1247_v17 = vadd.f32 %v1511_v12, %v1246_v16  ;;  %v1583_v18 = vpop.f32.mrb[7].mxu1  ;;  %v1250_v21 = vadd.f32 %v1244_v14, %v1020_v55 }
 0x45c   : > { %1254 = vadd.xlane.f32.xlu0 %v1250_v21  ;;  %v1251_v22 = vadd.f32 %v1247_v17, %v1021_v56 }
 0x45e   : > { %1256 = vadd.xlane.f32.xlu1 %v1251_v22 }
 0x4e9   : > { %v1255_v23 = vpop.xlane.xlu0 %1254 }
 0x4ea   : > { %v1258_v24 = vmul.f32 0.03125, %v1255_v23 }
 0x4eb   : > { %v1257_v26 = vpop.xlane.xlu1 %1256 }
 0x4ec   : > { %v1260_v27 = vsub.f32 %v1250_v21, %v1258_v24  ;;  %v1259_v19 = vmul.f32 0.03125, %v1257_v26 }
 0x4ee   : > { %v1261_v20 = vsub.f32 %v1251_v22, %v1259_v19  ;;  %v1262_v28 = vsel %vm509_vm8, %v1260_v27, 0.0 }
 0x4ef   : > { %v1264_v29 = vmul.f32 %v1262_v28, %v1262_v28 }
 0x4f0   : > { %v1263_v30 = vsel %vm509_vm8, %v1261_v20, 0.0 }
 0x4f1   : > { %1266 = vadd.xlane.f32.xlu0 %v1264_v29  ;;  %v1265_v32 = vmul.f32 %v1263_v30, %v1263_v30 }
 0x4f3   : > { %1268 = vadd.xlane.f32.xlu1 %v1265_v32 }
 0x57e   : > { %v1267_v31 = vpop.xlane.xlu0 %1266 }
 0x57f   : > { %v1270_v33 = vmul.f32 0.03125, %v1267_v31 }
 0x580   : > { %v1269_v34 = vpop.xlane.xlu1 %1268 }
 0x581   : > { %v1272_v35 = vadd.f32 1e-05, %v1270_v33  ;;  %v1271_v36 = vmul.f32 0.03125, %v1269_v34 }
 0x583   : > { %1704 = vrsqrt.f32 %v1272_v35  ;;  %v1273_v37 = vadd.f32 1e-05, %v1271_v36 }
 0x585   : > { %1706 = vrsqrt.f32 %v1273_v37 }
 0x58d   : > { %v1705_v38 = vpop.eup %1704 }
 0x58e   : > { %v1276_v25 = vmul.f32 %v1705_v38, %v1262_v28 }
 0x58f   : > { %v1707_v40 = vpop.eup %1706 }
 0x590   : > { %v1284_v42 = vmul.f32 %v1520_v39, %v1276_v25  ;;  %v1277_v43 = vmul.f32 %v1707_v40, %v1263_v30 }
 0x592   : > { %v1292_v44 = vadd.f32 %v1521_v41, %v1284_v42  ;;  %v1285_v45 = vmul.f32 %v1520_v39, %v1277_v43 }
 0x594   : > { %1294 = vst [vmem:[%s2010_s10] sm:$0xff] %v1292_v44  ;;  %v1293_v46 = vadd.f32 %v1521_v41, %v1285_v45 }
 0x596   : > { %1295 = vst [vmem:[%s2010_s10 + $0x8] sm:$0xff] %v1293_v46 }
 0x597 PF: > { %s20_s13 = sadd.s32 1, %s1714_s13  }
 0x598   : > { %p17_p5 = scmp.ge.s32.totalorder %s20_s13, 4  }
 0x59a   :  { %19 = sbr.rel (!%p17_p5) target bundleno = 2 (0x2), region = 116 }

</bundles_post_ra>
